<compile_context>
chip_gen: v7x
topology: tpu7x:2x2x1
jax: 0.10.0
libtpu: 0.0.40
codegen_flags: <defaults>
</compile_context>

<pallas_src>
import math

import jax
import jax.numpy as jnp
from jax.experimental import pallas as pl
from jax.experimental.pallas import tpu as pltpu

_LANE = 128     # lane width (last dim) for f32 vregs
_SUBLANE = 8    # sublane tile (second-to-last dim) for f32


def _round_up(x, m):
    return ((x + m - 1) // m) * m


def _pad2(a, rows, cols):
    """Zero-pad a 2-D array up to (rows, cols)."""
    r, c = a.shape
    return jnp.pad(a, ((0, rows - r), (0, cols - c)))


def _policy_kernel(x_ref, w1_ref, w2_ref, w3_ref, b_ref, o_ref):
    # One TILE_B x Kp state tile per grid step; weights/biases are whole-array,
    # VMEM-resident blocks.  Intermediates never leave VMEM/vregs.
    x = x_ref[...]
    b = b_ref[...]                                   # (3, L), loaded once

    h1 = jnp.dot(x, w1_ref[...], preferred_element_type=jnp.float32) + b[0:1, :]
    h1 = jnp.maximum(h1, 0.0)                        # ReLU (VPU)

    h2 = jnp.dot(h1, w2_ref[...], preferred_element_type=jnp.float32) + b[1:2, :]
    h2 = jnp.maximum(h2, 0.0)                        # ReLU (VPU)

    h3 = jnp.dot(h2, w3_ref[...], preferred_element_type=jnp.float32) + b[2:3, :]
    o_ref[...] = jnp.tanh(h3).astype(o_ref.dtype)    # tanh (EUP)


def policy_forward(state, params, *, tile_b=512):
    """state: [B, num_inputs] f32 -> actions [B, num_actions] f32."""
    w1, b1, w2, b2, w3, b3 = params
    B, num_inputs = state.shape
    hidden = w1.shape[1]
    num_actions = w3.shape[1]

    # Lane-pad feature dims to multiples of 128; use one common width L for the
    # hidden/action lane axis so the bias stack and weight blocks are uniform.
    Kp = _round_up(num_inputs, _LANE)
    L = max(_round_up(hidden, _LANE), _round_up(num_actions, _LANE))

    # Batch tile: at least one f32 sublane tile, at most `tile_b` rows per step.
    # (VMEM budget at defaults: 2 bufs x (state + out) x TILE_B x 128 x 4B
    #  + 3 resident 128x128 weights  <<  scoped VMEM on v5e/v6e/v7x.)
    TILE_B = min(tile_b, _round_up(B, _SUBLANE))
    Bp = _round_up(B, TILE_B)

    # Zero-pad operands to the dense layout (exact: zeros contribute nothing).
    xp = _pad2(state.astype(jnp.float32), Bp, Kp)
    w1p = _pad2(w1, Kp, L)
    w2p = _pad2(w2, L, L)
    w3p = _pad2(w3, L, L)
    bp = jnp.concatenate(
        [_pad2(b1, 1, L), _pad2(b2, 1, L), _pad2(b3, 1, L)], axis=0)  # (3, L)

    grid = (Bp // TILE_B,)

    out = pl.pallas_call(
        _policy_kernel,
        out_shape=jax.ShapeDtypeStruct((Bp, L), jnp.float32),
        grid=grid,
        in_specs=[
            pl.BlockSpec((TILE_B, Kp), lambda i: (i, 0)),   # state tile (pipelined)
            pl.BlockSpec((Kp, L), lambda i: (0, 0)),        # W1 (resident)
            pl.BlockSpec((L, L), lambda i: (0, 0)),         # W2 (resident)
            pl.BlockSpec((L, L), lambda i: (0, 0)),         # W3 (resident)
            pl.BlockSpec((3, L), lambda i: (0, 0)),         # fused biases (resident)
        ],
        out_specs=pl.BlockSpec((TILE_B, L), lambda i: (i, 0)),
        compiler_params=pltpu.CompilerParams(
            dimension_semantics=("parallel",),              # megacore on v7x
        ),
    )(xp, w1p, w2p, w3p, bp)

    return out[:B, :num_actions]


def init_policy_params(key, num_inputs, num_actions, hidden_size, init_w=0.003):
    """Deterministic init mirroring nn.Linear defaults + the uniform(-init_w, init_w)
    override on linear3.  Weights stored as [in, out] (transposed vs. PyTorch)."""
    k1, k2, k3, k4, k5, k6 = jax.random.split(key, 6)

    def linear_init(kw, kb, fan_in, fan_out):
        bound = 1.0 / math.sqrt(fan_in)
        w = jax.random.uniform(kw, (fan_in, fan_out), jnp.float32, -bound, bound)
        b = jax.random.uniform(kb, (1, fan_out), jnp.float32, -bound, bound)
        return w, b

    w1, b1 = linear_init(k1, k2, num_inputs, hidden_size)
    w2, b2 = linear_init(k3, k4, hidden_size, hidden_size)
    w3 = jax.random.uniform(k5, (hidden_size, num_actions), jnp.float32,
                            -init_w, init_w)
    b3 = jax.random.uniform(k6, (1, num_actions), jnp.float32, -init_w, init_w)
    return (w1, b1, w2, b2, w3, b3)


def _reference_forward(state, params):
    w1, b1, w2, b2, w3, b3 = params
    x = jnp.maximum(state @ w1 + b1, 0.0)
    x = jnp.maximum(x @ w2 + b2, 0.0)
    return jnp.tanh(x @ w3 + b3)


if __name__ == "__main__":
    B, num_inputs, num_actions, hidden = 2, 16, 4, 32

    key = jax.random.PRNGKey(0)
    k_state, k_params = jax.random.split(key)

    state = jax.random.normal(k_state, (B, num_inputs), jnp.float32)
    params = init_policy_params(k_params, num_inputs, num_actions, hidden)

    out = policy_forward(state, params)
    out = jax.block_until_ready(out)

    ref = _reference_forward(state, params)
    assert out.shape == (B, num_actions)
    assert jnp.allclose(out, ref, atol=1e-5, rtol=1e-5)

    # Also exercise a batch that spans multiple grid steps / tiles.
    big_state = jax.random.normal(k_state, (1037, num_inputs), jnp.float32)
    big_out = jax.block_until_ready(policy_forward(big_state, params))
    big_ref = _reference_forward(big_state, params)
    assert big_out.shape == (1037, num_actions)
    assert jnp.allclose(big_out, big_ref, atol=1e-5, rtol=1e-5)

    print("KERNEL_OK")
</pallas_src>

<mosaic_0001>
module attributes {stable_mosaic.version = 11 : i64} {
  func.func @_policy_kernel(%arg0: i32, %arg1: memref<8x128xf32, #tpu.memory_space<vmem>>, %arg2: memref<128x128xf32, #tpu.memory_space<vmem>>, %arg3: memref<128x128xf32, #tpu.memory_space<vmem>>, %arg4: memref<128x128xf32, #tpu.memory_space<vmem>>, %arg5: memref<3x128xf32, #tpu.memory_space<vmem>>, %arg6: memref<8x128xf32, #tpu.memory_space<vmem>>) attributes {dimension_semantics = [#tpu.dimension_semantics<parallel>], iteration_bounds = array<i64: 1>, scalar_prefetch = 0 : i64, scratch_operands = 0 : i64, tpu.core_type = #tpu.core_type<tc>, window_params = [{transform_indices = @transform_0, window_bounds = array<i64: 8, 128>}, {pipeline_mode = #tpu.pipeline_mode<synchronous>, transform_indices = @transform_1, window_bounds = array<i64: 128, 128>}, {pipeline_mode = #tpu.pipeline_mode<synchronous>, transform_indices = @transform_2, window_bounds = array<i64: 128, 128>}, {pipeline_mode = #tpu.pipeline_mode<synchronous>, transform_indices = @transform_3, window_bounds = array<i64: 128, 128>}, {pipeline_mode = #tpu.pipeline_mode<synchronous>, transform_indices = @transform_4, window_bounds = array<i64: 3, 128>}, {transform_indices = @transform_5, window_bounds = array<i64: 8, 128>}]} {
    %c0 = arith.constant 0 : index
    %c0_0 = arith.constant 0 : index
    %0 = vector.load %arg1[%c0, %c0_0] : memref<8x128xf32, #tpu.memory_space<vmem>>, vector<8x128xf32>
    %c0_1 = arith.constant 0 : index
    %c0_2 = arith.constant 0 : index
    %1 = vector.load %arg5[%c0_1, %c0_2] : memref<3x128xf32, #tpu.memory_space<vmem>>, vector<3x128xf32>
    %c0_3 = arith.constant 0 : index
    %c0_4 = arith.constant 0 : index
    %2 = vector.load %arg2[%c0_3, %c0_4] : memref<128x128xf32, #tpu.memory_space<vmem>>, vector<128x128xf32>
    %cst = arith.constant dense<0.000000e+00> : vector<8x128xf32>
    %3 = tpu.matmul %0, %2, %cst {dimension_numbers = #tpu.dot_dimension_numbers<[1], [0], [0], [1], [0, 0, 1, 1], [], []>} : vector<8x128xf32>, vector<128x128xf32>, vector<8x128xf32> -> vector<8x128xf32>
    %4 = vector.extract_strided_slice %1 {offsets = [0, 0], sizes = [1, 128], strides = [1, 1]} : vector<3x128xf32> to vector<1x128xf32>
    %5 = vector.broadcast %4 : vector<1x128xf32> to vector<8x128xf32>
    %6 = arith.addf %3, %5 : vector<8x128xf32>
    %cst_5 = arith.constant 0.000000e+00 : f32
    %7 = vector.broadcast %cst_5 : f32 to vector<8x128xf32>
    %8 = arith.maximumf %6, %7 : vector<8x128xf32>
    %c0_6 = arith.constant 0 : index
    %c0_7 = arith.constant 0 : index
    %9 = vector.load %arg3[%c0_6, %c0_7] : memref<128x128xf32, #tpu.memory_space<vmem>>, vector<128x128xf32>
    %cst_8 = arith.constant dense<0.000000e+00> : vector<8x128xf32>
    %10 = tpu.matmul %8, %9, %cst_8 {dimension_numbers = #tpu.dot_dimension_numbers<[1], [0], [0], [1], [0, 0, 1, 1], [], []>} : vector<8x128xf32>, vector<128x128xf32>, vector<8x128xf32> -> vector<8x128xf32>
    %11 = vector.extract_strided_slice %1 {offsets = [1, 0], sizes = [1, 128], strides = [1, 1]} : vector<3x128xf32> to vector<1x128xf32>
    %12 = vector.broadcast %11 : vector<1x128xf32> to vector<8x128xf32>
    %13 = arith.addf %10, %12 : vector<8x128xf32>
    %cst_9 = arith.constant 0.000000e+00 : f32
    %14 = vector.broadcast %cst_9 : f32 to vector<8x128xf32>
    %15 = arith.maximumf %13, %14 : vector<8x128xf32>
    %c0_10 = arith.constant 0 : index
    %c0_11 = arith.constant 0 : index
    %16 = vector.load %arg4[%c0_10, %c0_11] : memref<128x128xf32, #tpu.memory_space<vmem>>, vector<128x128xf32>
    %cst_12 = arith.constant dense<0.000000e+00> : vector<8x128xf32>
    %17 = tpu.matmul %15, %16, %cst_12 {dimension_numbers = #tpu.dot_dimension_numbers<[1], [0], [0], [1], [0, 0, 1, 1], [], []>} : vector<8x128xf32>, vector<128x128xf32>, vector<8x128xf32> -> vector<8x128xf32>
    %18 = vector.extract_strided_slice %1 {offsets = [2, 0], sizes = [1, 128], strides = [1, 1]} : vector<3x128xf32> to vector<1x128xf32>
    %19 = vector.broadcast %18 : vector<1x128xf32> to vector<8x128xf32>
    %20 = arith.addf %17, %19 : vector<8x128xf32>
    %21 = math.tanh %20 : vector<8x128xf32>
    %c0_13 = arith.constant 0 : index
    %c0_14 = arith.constant 0 : index
    %22 = vector.load %arg6[%c0_13, %c0_14] : memref<8x128xf32, #tpu.memory_space<vmem>>, vector<8x128xf32>
    tpu.vector_store %arg6[%c0_13, %c0_14], %21 {strides = array<i32>} : memref<8x128xf32, #tpu.memory_space<vmem>>, vector<8x128xf32>,
    return
  }
  func.func @transform_0(%arg0: i32) -> (i32, i32) {
    %c0_i32 = arith.constant 0 : i32
    %c0_i32_0 = arith.constant 0 : i32
    return %arg0, %c0_i32 : i32, i32
  }
  func.func @transform_1(%arg0: i32) -> (i32, i32) {
    %c0_i32 = arith.constant 0 : i32
    %c0_i32_0 = arith.constant 0 : i32
    %c0_i32_1 = arith.constant 0 : i32
    return %c0_i32, %c0_i32_0 : i32, i32
  }
  func.func @transform_2(%arg0: i32) -> (i32, i32) {
    %c0_i32 = arith.constant 0 : i32
    %c0_i32_0 = arith.constant 0 : i32
    %c0_i32_1 = arith.constant 0 : i32
    return %c0_i32, %c0_i32_0 : i32, i32
  }
  func.func @transform_3(%arg0: i32) -> (i32, i32) {
    %c0_i32 = arith.constant 0 : i32
    %c0_i32_0 = arith.constant 0 : i32
    %c0_i32_1 = arith.constant 0 : i32
    return %c0_i32, %c0_i32_0 : i32, i32
  }
  func.func @transform_4(%arg0: i32) -> (i32, i32) {
    %c0_i32 = arith.constant 0 : i32
    %c0_i32_0 = arith.constant 0 : i32
    %c0_i32_1 = arith.constant 0 : i32
    return %c0_i32, %c0_i32_0 : i32, i32
  }
  func.func @transform_5(%arg0: i32) -> (i32, i32) {
    %c0_i32 = arith.constant 0 : i32
    %c0_i32_0 = arith.constant 0 : i32
    return %arg0, %c0_i32 : i32, i32
  }
}

</mosaic_0001>

<bundles_post_ra>
// kernel: tpu_custom_call.1
= control target key start
LH: loop header
LB: loop body
LE: loop exit
PB: predicated region body
PF: predicated region fallthrough
CT: control target
= control target key end

     0   :  { %10 = vsyncpa [#allocation3], 0  ;;  %s867_s0 = inlined_call_operand.hbm [shape: f32[8,128], index: 0, kind: input, shape index: {}]   ;;  %s868_s1 = inlined_call_operand.hbm [shape: f32[128,128], index: 1, kind: input, shape index: {}]   ;;  %s869_s2 = inlined_call_operand.hbm [shape: f32[128,128], index: 2, kind: input, shape index: {}]   ;;  %s870_s3 = inlined_call_operand.hbm [shape: f32[128,128], index: 3, kind: input, shape index: {}]   ;;  %s871_s4 = inlined_call_operand.vmem [shape: f32[3,128], index: 4, kind: input, shape index: {}]   ;;  %s872_s5 = inlined_call_operand.hbm [shape: f32[8,128], index: 5, kind: output, shape index: {}]  }
   0x1   :  { %11 = vsyncpa [#allocation6], 0 }
   0x2   :  { %12 = vsyncpa [#allocation9], 0 }
   0x3   :  { %13 = vsyncpa [#allocation4], 0  ;;  %s725_s18 = smov [#allocation5]   ;;  %s607_s22 = scalar_lea.hbm %s868_s1, 2048 }
   0x4   :  { %s29_s19 = sshll.u32 %s725_s18, 4  ;;  %p608_p0 = scmp.ne.s32.totalorder %s868_s1, %s607_s22  ;;  %s30_s19 = int_to_ptr.vmem [resolvable:$true] %s29_s19 }
   0x5   :  { %p611_p1 = scmp.lt.u32.totalorder %s607_s22, %s868_s1 }
   0x7   :  { %p613_p2 = pnand %p611_p1, %p608_p0 }
   0x9   :  { %616 = shalt.err (!%p613_p2)
}
   0xa   :  { %s617_s27 = scalar_lea.vmem %s30_s19, 2048  ;;  %p622_p4 = scmp.lt.s32.totalorder %s30_s19, %s30_s19 }
   0xb   :  { %p618_p3 = scmp.ne.s32.totalorder %s30_s19, %s617_s27  ;;  %p623_p5 = scmp.lt.s32.totalorder %s617_s27, %s617_s27 }
   0xd   :  { %p624_p6 = por %p623_p5, %p622_p4 }
   0xf   :  { %p625_p7 = pnand %p624_p6, %p618_p3 }
  0x11   :  { %628 = shalt.err (!%p625_p7)
}
  0x12   :  { %s726_s28 = smov 128   ;;  %s727_s29 = smov 8  }
  0x13   :  { %35 = dma.hbm_to_vmem [thread:$0]  %s868_s1, 2048, %s30_s19, [#allocation6], %s726_s28, %s726_s28, %s727_s29  }
  0x14   :  { %s728_s7 = smov [#allocation2]   ;;  %s729_s9 = smov [#allocation7]  }
  0x15   :  { %s20_s8 = sshll.u32 %s728_s7, 4  ;;  %s41_s10 = sshll.u32 %s729_s9, 4  ;;  %s21_s8 = int_to_ptr.vmem [resolvable:$true] %s20_s8  ;;  %s42_s10 = int_to_ptr.vmem [resolvable:$true] %s41_s10 }
  0x16   :  { %s629_s13 = scalar_lea.hbm %s867_s0, 128 }
  0x17   :  { %p630_p8 = scmp.ne.s32.totalorder %s867_s0, %s629_s13  ;;  %p633_p9 = scmp.lt.u32.totalorder %s629_s13, %s867_s0 }
  0x19   :  { %p635_p10 = pnand %p633_p9, %p630_p8 }
  0x1b   :  { %638 = shalt.err (!%p635_p10)
}
  0x1c   :  { %s639_s1 = scalar_lea.vmem %s21_s8, 128  ;;  %p644_p12 = scmp.lt.s32.totalorder %s21_s8, %s21_s8 }
  0x1d   :  { %p640_p11 = scmp.ne.s32.totalorder %s21_s8, %s639_s1  ;;  %p645_p13 = scmp.lt.s32.totalorder %s639_s1, %s639_s1 }
  0x1f   :  { %p646_p0 = por %p645_p13, %p644_p12 }
  0x21   :  { %p647_p1 = pnand %p646_p0, %p640_p11 }
  0x23   :  { %650 = shalt.err (!%p647_p1)
}
  0x24   :  { %23 = dma.hbm_to_vmem [thread:$0]  %s867_s0, 128, %s21_s8, [#allocation3]  }
  0x25   :  { %s651_s22 = scalar_lea.hbm %s869_s2, 2048 }
  0x26   :  { %p652_p2 = scmp.ne.s32.totalorder %s869_s2, %s651_s22  ;;  %p655_p3 = scmp.lt.u32.totalorder %s651_s22, %s869_s2 }
  0x28   :  { %p657_p4 = pnand %p655_p3, %p652_p2 }
  0x2a   :  { %660 = shalt.err (!%p657_p4)
}
  0x2b   :  { %s661_s27 = scalar_lea.vmem %s42_s10, 2048  ;;  %p666_p6 = scmp.lt.s32.totalorder %s42_s10, %s42_s10 }
  0x2c   :  { %p662_p5 = scmp.ne.s32.totalorder %s42_s10, %s661_s27  ;;  %p667_p7 = scmp.lt.s32.totalorder %s661_s27, %s661_s27 }
  0x2e   :  { %p668_p8 = por %p667_p7, %p666_p6 }
  0x30   :  { %p669_p9 = pnand %p668_p8, %p662_p5 }
  0x32   :  { %672 = shalt.err (!%p669_p9)
}
  0x33   :  { %47 = dma.hbm_to_vmem [thread:$0]  %s869_s2, 2048, %s42_s10, [#allocation6], %s726_s28, %s726_s28, %s727_s29  }
  0x34   :  { %s730_s6 = smov [#allocation8]   ;;  %s673_s11 = scalar_lea.hbm %s870_s3, 2048 }
  0x35   :  { %s53_s7 = sshll.u32 %s730_s6, 4  ;;  %p674_p10 = scmp.ne.s32.totalorder %s870_s3, %s673_s11  ;;  %s54_s7 = int_to_ptr.vmem [resolvable:$true] %s53_s7 }
  0x36   :  { %p677_p11 = scmp.lt.u32.totalorder %s673_s11, %s870_s3 }
  0x38   :  { %p679_p12 = pnand %p677_p11, %p674_p10 }
  0x3a   :  { %682 = shalt.err (!%p679_p12)
}
  0x3b   :  { %s683_s16 = scalar_lea.vmem %s54_s7, 2048  ;;  %p688_p0 = scmp.lt.s32.totalorder %s54_s7, %s54_s7 }
  0x3c   :  { %p684_p13 = scmp.ne.s32.totalorder %s54_s7, %s683_s16  ;;  %p689_p1 = scmp.lt.s32.totalorder %s683_s16, %s683_s16 }
  0x3e   :  { %p690_p2 = por %p689_p1, %p688_p0 }
  0x40   :  { %p691_p3 = pnand %p690_p2, %p684_p13 }
  0x42   :  { %694 = shalt.err (!%p691_p3)
}
  0x43   :  { %59 = dma.hbm_to_vmem [thread:$0]  %s870_s3, 2048, %s54_s7, [#allocation9], %s726_s28, %s726_s28, %s727_s29  }
  0x44   :  { %717 = dma.done.wait [#allocation3], 128  }
  0x45   :  { %718 = vsyncadd [#allocation3], 4294967168 }
  0x46   :  { %719 = dma.done.wait [#allocation6], 4096  }
  0x47   :  { %720 = vsyncadd [#allocation6], 4294963200 }
  0x48   :  { %721 = dma.done.wait [#allocation9], 2048  }
  0x49   :  { %722 = vsyncadd [#allocation9], 4294965248  ;;  %v731_v0 = vmov 0.0|0.0   ;;  %vm732_vm0 = vmmov 0   ;;  %v733_v1 = vmov 0.0   ;;  %v76_v2 = vld [vmem:[#allocation5] sm:$0xff] }
  0x4a   :  { %523 = vmatprep.subr.bf16.mxu0 %v731_v0  ;;  %450 = vmatprep.mubr.msk.f32.mxu0 %vm732_vm0, %v733_v1  ;;  %v77_v3 = vld [vmem:[#allocation5 + $0x8] sm:$0xff]  ;;  %v78_v4 = vld [vmem:[#allocation5 + $0x10] sm:$0xff]  ;;  %v79_v6 = vld [vmem:[#allocation5 + $0x18] sm:$0xff] }
  0x4b   :  { %547 = vmatprep.subr.bf16.mxu1 %v731_v0  ;;  %485 = vmatprep.mubr.msk.f32.mxu1 %vm732_vm0, %v733_v1  ;;  %v524_v5 = vpack.c.bf16 %v77_v3, %v76_v2  ;;  %v527_v7 = vpack.c.bf16 %v79_v6, %v78_v4  ;;  %v80_v8 = vld [vmem:[#allocation5 + $0x20] sm:$0xff]  ;;  %v81_v9 = vld [vmem:[#allocation5 + $0x28] sm:$0xff]  ;;  %v169_v12 = vld [vmem:[#allocation7 + $0x10] sm:$0xff] }
  0x4c   :  { %v167_v10 = vld [vmem:[#allocation7] sm:$0xff]  ;;  %v168_v11 = vld [vmem:[#allocation7 + $0x8] sm:$0xff]  ;;  %v170_v13 = vld [vmem:[#allocation7 + $0x18] sm:$0xff]  ;;  %v530_v14 = vpack.c.bf16 %v81_v9, %v80_v8  ;;  %v92_v9 = vlaneseq }
  0x4d   :  { %525 = vmatpush3.bf16.msra.mxu0 %v524_v5  ;;  %v548_v15 = vpack.c.bf16 %v168_v11, %v167_v10  ;;  %v82_v16 = vld [vmem:[#allocation5 + $0x30] sm:$0xff]  ;;  %v83_v17 = vld [vmem:[#allocation5 + $0x38] sm:$0xff]  ;;  %v551_v18 = vpack.c.bf16 %v170_v13, %v169_v12  ;;  %v171_v19 = vld [vmem:[#allocation7 + $0x20] sm:$0xff] }
  0x4e   :  { %526 = vmatprep.subr.bf16.mxu0 %v731_v0  ;;  %v172_v20 = vld [vmem:[#allocation7 + $0x28] sm:$0xff]  ;;  %v533_v21 = vpack.c.bf16 %v83_v17, %v82_v16  ;;  %v84_v22 = vld [vmem:[#allocation5 + $0x40] sm:$0xff]  ;;  %v173_v25 = vld [vmem:[#allocation7 + $0x30] sm:$0xff]  ;;  %v93_v10 = vshrl.u32 %v92_v9, 7 }
  0x4f   :  { %549 = vmatpush3.bf16.msra.mxu1 %v548_v15  ;;  %v85_v23 = vld [vmem:[#allocation5 + $0x48] sm:$0xff]  ;;  %v554_v24 = vpack.c.bf16 %v172_v20, %v171_v19  ;;  %v174_v26 = vld [vmem:[#allocation7 + $0x38] sm:$0xff]  ;;  %v86_v28 = vld [vmem:[#allocation5 + $0x50] sm:$0xff] }
  0x50   :  { %550 = vmatprep.subr.bf16.mxu1 %v731_v0  ;;  %v536_v27 = vpack.c.bf16 %v85_v23, %v84_v22  ;;  %v87_v29 = vld [vmem:[#allocation5 + $0x58] sm:$0xff]  ;;  %v557_v30 = vpack.c.bf16 %v174_v26, %v173_v25  ;;  %v175_v31 = vld [vmem:[#allocation7 + $0x40] sm:$0xff]  ;;  %v176_v32 = vld [vmem:[#allocation7 + $0x48] sm:$0xff]  ;;  %v94_v11 = vsub.s32 0, %v93_v10  ;;  %v276_v26 = vsub.s32 2, %v93_v10 }
  0x51   :  { %528 = vmatpush3.bf16.msra.mxu0 %v527_v7  ;;  %v539_v33 = vpack.c.bf16 %v87_v29, %v86_v28  ;;  %v88_v34 = vld [vmem:[#allocation5 + $0x60] sm:$0xff]  ;;  %v89_v35 = vld [vmem:[#allocation5 + $0x68] sm:$0xff]  ;;  %v560_v36 = vpack.c.bf16 %v176_v32, %v175_v31  ;;  %v177_v37 = vld [vmem:[#allocation7 + $0x50] sm:$0xff] }
  0x52   :  { %529 = vmatprep.subr.bf16.mxu0 %v731_v0  ;;  %v178_v38 = vld [vmem:[#allocation7 + $0x58] sm:$0xff]  ;;  %v542_v39 = vpack.c.bf16 %v89_v35, %v88_v34  ;;  %v90_v40 = vld [vmem:[#allocation5 + $0x70] sm:$0xff]  ;;  %v179_v43 = vld [vmem:[#allocation7 + $0x60] sm:$0xff] }
  0x53   :  { %552 = vmatpush3.bf16.msra.mxu1 %v551_v18  ;;  %v91_v41 = vld [vmem:[#allocation5 + $0x78] sm:$0xff]  ;;  %v563_v42 = vpack.c.bf16 %v178_v38, %v177_v37  ;;  %v180_v44 = vld [vmem:[#allocation7 + $0x68] sm:$0xff]  ;;  %v181_v48 = vld [vmem:[#allocation7 + $0x70] sm:$0xff] }
  0x54   :  { %553 = vmatprep.subr.bf16.mxu1 %v731_v0  ;;  %v545_v45 = vpack.c.bf16 %v91_v41, %v90_v40  ;;  %v566_v46 = vpack.c.bf16 %v180_v44, %v179_v43  ;;  %v74_v47 = vld [vmem:[#allocation2] sm:$0xff]  ;;  %v258_v51 = vld [vmem:[#allocation8] sm:$0xff]  ;;  %v259_v52 = vld [vmem:[#allocation8 + $0x8] sm:$0xff] }
  0x55   :  { %531 = vmatpush3.bf16.msra.mxu0 %v530_v14  ;;  %v182_v49 = vld [vmem:[#allocation7 + $0x78] sm:$0xff]  ;;  %v260_v53 = vld [vmem:[#allocation8 + $0x10] sm:$0xff]  ;;  %v572_v54 = vpack.c.bf16 %v259_v52, %v258_v51  ;;  %v262_v57 = vld [vmem:[#allocation8 + $0x20] sm:$0xff] }
  0x56   :  { %532 = vmatprep.subr.bf16.mxu0 %v731_v0  ;;  %v569_v50 = vpack.c.bf16 %v182_v49, %v181_v48  ;;  %v261_v55 = vld [vmem:[#allocation8 + $0x18] sm:$0xff]  ;;  %v263_v58 = vld [vmem:[#allocation8 + $0x28] sm:$0xff]  ;;  %v264_v60 = vld [vmem:[#allocation8 + $0x30] sm:$0xff] }
  0x57   :  { %555 = vmatpush3.bf16.msra.mxu1 %v554_v24  ;;  %v575_v56 = vpack.c.bf16 %v261_v55, %v260_v53  ;;  %v578_v59 = vpack.c.bf16 %v263_v58, %v262_v57  ;;  %v265_v61 = vld [vmem:[#allocation8 + $0x38] sm:$0xff]  ;;  %v266_v63 = vld [vmem:[#allocation8 + $0x40] sm:$0xff]  ;;  %v268_v3 = vld [vmem:[#allocation8 + $0x50] sm:$0xff] }
  0x58   :  { %556 = vmatprep.subr.bf16.mxu1 %v731_v0  ;;  %v581_v62 = vpack.c.bf16 %v265_v61, %v264_v60  ;;  %v269_v4 = vld [vmem:[#allocation8 + $0x58] sm:$0xff]  ;;  %v270_v6 = vld [vmem:[#allocation8 + $0x60] sm:$0xff]  ;;  %v271_v7 = vld [vmem:[#allocation8 + $0x68] sm:$0xff] }
  0x59   :  { %534 = vmatpush3.bf16.msra.mxu0 %v533_v21  ;;  %v587_v5 = vpack.c.bf16 %v269_v4, %v268_v3  ;;  %v590_v8 = vpack.c.bf16 %v271_v7, %v270_v6  ;;  %v75_v12 = vld [vmem:[%s871_s4] sm:$0x7]  ;;  %v272_v18 = vld [vmem:[#allocation8 + $0x70] sm:$0xff]  ;;  %v185_v21 = vsub.s32 1, %v93_v10  ;;  %s734_s4 = smov [#allocation10]  }
  0x5a   :  { %535 = vmatprep.subr.bf16.mxu0 %v731_v0  ;;  %v95_v13 = vrot.slane %v75_v12, %v94_v11  ;;  %v273_v19 = vld [vmem:[#allocation8 + $0x78] sm:$0xff]  ;;  %s356_s29 = sshll.u32 %s734_s4, 4  ;;  %s357_s29 = int_to_ptr.vmem [resolvable:$true] %s356_s29 }
  0x5b   :  { %558 = vmatpush3.bf16.msra.mxu1 %v557_v30  ;;  %v593_v20 = vpack.c.bf16 %v273_v19, %v272_v18  ;;  %v186_v22 = vrot.slane %v75_v12, %v185_v21  ;;  %s695_s17 = scalar_lea.vmem %s357_s29, 128  ;;  %p700_p5 = scmp.lt.s32.totalorder %s357_s29, %s357_s29 }
  0x5c   :  { %559 = vmatprep.subr.bf16.mxu1 %v731_v0  ;;  %p696_p4 = scmp.ne.s32.totalorder %s357_s29, %s695_s17  ;;  %p701_p6 = scmp.lt.s32.totalorder %s695_s17, %s695_s17 }
  0x5d   :  { %537 = vmatpush3.bf16.msra.mxu0 %v536_v27  ;;  %v277_v27 = vrot.slane %v75_v12, %v276_v26 }
  0x5e   :  { %538 = vmatprep.subr.bf16.mxu0 %v731_v0  ;;  %p702_p7 = por %p701_p6, %p700_p5 }
  0x5f   :  { %561 = vmatpush3.bf16.msra.mxu1 %v560_v36 }
  0x60   :  { %562 = vmatprep.subr.bf16.mxu1 %v731_v0  ;;  %p703_p8 = pnand %p702_p7, %p696_p4 }
  0x61   :  { %540 = vmatpush3.bf16.msra.mxu0 %v539_v33 }
  0x62   :  { %541 = vmatprep.subr.bf16.mxu0 %v731_v0 }
  0x63   :  { %564 = vmatpush3.bf16.msra.mxu1 %v563_v42 }
  0x64   :  { %565 = vmatprep.subr.bf16.mxu1 %v731_v0 }
  0x65   :  { %543 = vmatpush3.bf16.msra.mxu0 %v542_v39 }
  0x66   :  { %544 = vmatprep.subr.bf16.mxu0 %v731_v0 }
  0x67   :  { %567 = vmatpush3.bf16.msra.mxu1 %v566_v46 }
  0x68   :  { %568 = vmatprep.subr.bf16.mxu1 %v731_v0 }
  0x69   :  { %546 = vmatpush3.bf16.msra.mxu0 %v545_v45 }
  0x6a   :  { %571 = vmatprep.subr.bf16.mxu0 %v731_v0 }
  0x6b   :  { %570 = vmatpush3.bf16.msra.mxu1 %v569_v50 }
  0x6c   :  { %451 = vmatmul.mubr.f32.vlgmr.msra.gmra.mrb[0].mxu0 %v74_v47 }
  0x6d   :  { %520 = vmatprep.mubr.msk.f32.mxu0 %vm732_vm0, %v733_v1  ;;  %573 = vmatpush3.bf16.msra.mxu0 %v572_v54  ;;  %v267_v1 = vld [vmem:[#allocation8 + $0x48] sm:$0xff] }
  0x6e   :  { %574 = vmatprep.subr.bf16.mxu0 %v731_v0  ;;  %v584_v2 = vpack.c.bf16 %v267_v1, %v266_v63 }
  0x71   :  { %576 = vmatpush3.bf16.msra.mxu0 %v575_v56 }
  0x72   :  { %577 = vmatprep.subr.bf16.mxu0 %v731_v0 }
  0x75   :  { %579 = vmatpush3.bf16.msra.mxu0 %v578_v59 }
  0x76   :  { %580 = vmatprep.subr.bf16.mxu0 %v731_v0 }
  0x79   :  { %582 = vmatpush3.bf16.msra.mxu0 %v581_v62 }
  0x7a   :  { %583 = vmatprep.subr.bf16.mxu0 %v731_v0 }
  0x7d   :  { %585 = vmatpush3.bf16.msra.mxu0 %v584_v2 }
  0x7e   :  { %586 = vmatprep.subr.bf16.mxu0 %v731_v0 }
  0x81   :  { %588 = vmatpush3.bf16.msra.mxu0 %v587_v5 }
  0x82   :  { %589 = vmatprep.subr.bf16.mxu0 %v731_v0 }
  0x85   :  { %591 = vmatpush3.bf16.msra.mxu0 %v590_v8 }
  0x86   :  { %592 = vmatprep.subr.bf16.mxu0 %v731_v0 }
  0x89   :  { %594 = vmatpush3.bf16.msra.mxu0 %v593_v20 }
 0x13f   :  { %v162_v14 = vpop.f32.mrb[0].mxu0 }
 0x140   :  { %v163_v15 = vadd.f32 %v162_v14, %v95_v13  ;;  %v452_v16 = vpop.f32.mrb[1].mxu0 }
 0x142   :  { %v166_v17 = vmax.f32 %v163_v15, 0.0 }
 0x144   :  { %486 = vmatmul.mubr.f32.vlgmr.msra.gmra.mrb[0].mxu1 %v166_v17 }
 0x217   :  { %v253_v0 = vpop.f32.mrb[0].mxu1 }
 0x218   :  { %v254_v23 = vadd.f32 %v253_v0, %v186_v22  ;;  %v487_v24 = vpop.f32.mrb[1].mxu1 }
 0x21a   :  { %v257_v25 = vmax.f32 %v254_v23, 0.0 }
 0x21c   :  { %521 = vmatmul.mubr.f32.vlgmr.msra.gmra.mrb[2].mxu0 %v257_v25 }
 0x2ef   :  { %v344_v28 = vpop.f32.mrb[2].mxu0 }
 0x2f0   :  { %v345_v29 = vadd.f32 %v344_v28, %v277_v27  ;;  %v522_v30 = vpop.f32.mrb[3].mxu0 }
 0x2f2   :  { %605 = vtanh.f32 %v345_v29 }
 0x2fc   :  { %v606_v31 = vpop.eup %605 }
 0x2fd   :  { %349 = vst [vmem:[#allocation10] sm:$0xff] %v606_v31 }
 0x2fe   :  { %706 = shalt.err (!%p703_p8)
}
 0x2ff   :  { %s707_s19 = scalar_lea.hbm %s872_s5, 128 }
 0x300   :  { %p708_p9 = scmp.ne.s32.totalorder %s872_s5, %s707_s19  ;;  %p711_p10 = scmp.lt.u32.totalorder %s707_s19, %s872_s5 }
 0x302   :  { %p713_p11 = pnand %p711_p10, %p708_p9 }
 0x304   :  { %716 = shalt.err (!%p713_p11)
}
 0x305   :  { %359 = dma.vmem_to_hbm [thread:$0]  %s357_s29, 128, %s872_s5, [#allocation4]  }
 0x306   :  { %723 = dma.done.wait [#allocation4], 128  }
 0x307   :  { %724 = vsyncadd [#allocation4], 4294967168 }
 0x308   :  { %363 = vsyncpa [#allocation3], 1 }
 0x309   :  { %364 = vsyncpa [#allocation6], 1 }
 0x30a   :  { %365 = vsyncpa [#allocation9], 1 }
 0x30b   :  { %366 = vsyncpa [#allocation4], 1 }

</bundles_post_ra>
